<compile_context>
chip_gen: v6e
topology: v6e:2x2x1
jax: 0.10.0
libtpu: 0.0.40
codegen_flags: <defaults>
</compile_context>

<pallas_src>
import functools

import jax
import jax.numpy as jnp
from jax.experimental import pallas as pl
from jax.experimental.pallas import tpu as pltpu


# --------------------------------------------------------------------------- #
# helpers
# --------------------------------------------------------------------------- #
def _round_up(x, m):
    return ((x + m - 1) // m) * m


def _pick_hidden_tile(hidden, target, granule=128):
    """Largest multiple of `granule` <= target that divides `hidden`;
    falls back to the full hidden dim if none exists (or hidden <= target)."""
    if hidden <= target:
        return hidden
    t = (target // granule) * granule
    while t >= granule:
        if hidden % t == 0:
            return t
        t -= granule
    return hidden


def _vmem_capacity_bytes():
    """Physical VMEM per TensorCore; conservative fallback if the query fails."""
    try:
        info = pltpu.get_tpu_info()
        cap = getattr(info, "vmem_capacity_bytes", None)
        if cap:
            return int(cap)
    except Exception:
        pass
    return 64 * 2**20  # v7x-sized fallback: safe on every generation


def _vmem_bytes(tm, tn, d_model, pbytes, obytes, use_scratch):
    """Estimated VMEM footprint of one pipelined step (double buffers counted)."""
    b = 2 * tm * d_model * pbytes          # x tile
    b += 2 * 2 * d_model * tn * pbytes     # W1^T, W3^T tiles
    b += 2 * tn * d_model * pbytes         # W2^T tile
    b += 2 * (2 * tn + d_model) * 4        # f32 bias tiles (sublane-padded ~8x, tiny)
    b += 2 * tm * d_model * obytes         # output tile
    if use_scratch:
        b += tm * d_model * 4              # f32 accumulator scratch
    return b


def _choose_tiles(n16, d_model, hidden, pbytes, obytes, use_scratch, vmem_budget):
    """Pick (tm, tn): maximize token tile (arithmetic intensity ~ tm flops per
    weight byte), prefer full weight residency when it fits without crippling tm."""
    def fits(tm_, tn_):
        return _vmem_bytes(tm_, tn_, d_model, pbytes, obytes, use_scratch) <= vmem_budget

    tm_cap = n16 if n16 <= 256 else min(1024, _round_up(n16, 256))
    tm_cands = [t for t in (1024, 768, 512, 384, 256, 192, 128, 64, 32, 16)
                if t <= tm_cap]
    if not tm_cands or tm_cands[0] != tm_cap:
        tm_cands = [tm_cap] + tm_cands

    # 1) full weight residency: weights DMAed once total (j axis collapses).
    for tm_ in tm_cands:
        if tm_ >= min(256, n16) and fits(tm_, hidden):
            return tm_, hidden
    # 2) stream the hidden axis with a small tile; spend VMEM on a big tm.
    tn_ = _pick_hidden_tile(hidden, 256)
    for tm_ in tm_cands:
        if fits(tm_, tn_):
            return tm_, tn_
    # 3) last resort (tiny VMEM budget).
    return tm_cands[-1], _pick_hidden_tile(hidden, 128)


# --------------------------------------------------------------------------- #
# kernels
# --------------------------------------------------------------------------- #
def _swiglu_partial(x_ref, w1_ref, b1_ref, w3_ref, b3_ref, w2_ref):
    """Partial down-projection for one hidden tile: f32 (tm, d_model)."""
    x = x_ref[...]                                                 # (tm, d) bf16
    h1 = jnp.dot(x, w1_ref[...],
                 preferred_element_type=jnp.float32) + b1_ref[...]  # (tm, tn) f32
    h3 = jnp.dot(x, w3_ref[...],
                 preferred_element_type=jnp.float32) + b3_ref[...]
    h = (h1 * jax.nn.sigmoid(h1) * h3).astype(w2_ref.dtype)        # SiLU*gate, bf16
    return jnp.dot(h, w2_ref[...], preferred_element_type=jnp.float32)


def _ffn_kernel_f32_out(x_ref, w1_ref, b1_ref, w3_ref, b3_ref, w2_ref, b2_ref,
                        o_ref):
    """f32 output: o_ref is resident across the hidden axis -> accumulate in place."""
    j = pl.program_id(1)

    @pl.when(j == 0)
    def _():
        o_ref[...] = jnp.zeros_like(o_ref)

    o_ref[...] += _swiglu_partial(x_ref, w1_ref, b1_ref, w3_ref, b3_ref, w2_ref)

    @pl.when(j == pl.num_programs(1) - 1)
    def _():
        o_ref[...] += b2_ref[...]


def _ffn_kernel_acc(x_ref, w1_ref, b1_ref, w3_ref, b3_ref, w2_ref, b2_ref,
                    o_ref, acc_ref):
    """Narrow output dtype: accumulate in an f32 scratch, cast at the end."""
    j = pl.program_id(1)

    @pl.when(j == 0)
    def _():
        acc_ref[...] = jnp.zeros_like(acc_ref)

    acc_ref[...] += _swiglu_partial(x_ref, w1_ref, b1_ref, w3_ref, b3_ref, w2_ref)

    @pl.when(j == pl.num_programs(1) - 1)
    def _():
        o_ref[...] = (acc_ref[...] + b2_ref[...]).astype(o_ref.dtype)


# --------------------------------------------------------------------------- #
# wrapper
# --------------------------------------------------------------------------- #
@functools.partial(jax.jit, static_argnames=("tm", "tn", "param_dtype"))
def feed_forward(x, w1, b1, w2, b2, w3, b3, *, tm=None, tn=None,
                 param_dtype=jnp.bfloat16):
    """SwiGLU FFN.

    x : (batch, seq, d_model)
    w1, w3 : (hidden, d_model)   (PyTorch nn.Linear (out, in) layout)
    w2     : (d_model, hidden)
    b1, b3 : (hidden,) ; b2 : (d_model,)
    tm/tn  : optional explicit token / hidden tiles (auto-tuned if None).
    """
    batch, seq, d_model = x.shape
    hidden = w1.shape[0]
    n = batch * seq

    pbytes = jnp.dtype(param_dtype).itemsize
    obytes = jnp.dtype(x.dtype).itemsize
    out_is_f32 = jnp.dtype(x.dtype) == jnp.float32
    use_scratch = not out_is_f32

    # ---- VMEM budget (clamped to physical capacity; fixes v7x) --------------
    vmem_budget = int(0.85 * _vmem_capacity_bytes())

    # ---- tile sizing ---------------------------------------------------------
    n16 = max(16, _round_up(n, 16))           # bf16 sublane-friendly token count
    if tm is None or tn is None:
        tm_auto, tn_auto = _choose_tiles(n16, d_model, hidden, pbytes, obytes,
                                         use_scratch, vmem_budget)
        tm_eff = tm_auto if tm is None else _round_up(min(tm, n16), 16)
        tn_eff = tn_auto if tn is None else _pick_hidden_tile(hidden, tn)
    else:
        tm_eff = _round_up(min(tm, n16), 16)
        tn_eff = _pick_hidden_tile(hidden, tn)

    n_pad = _round_up(n, tm_eff)              # pad ragged token counts
    grid = (n_pad // tm_eff, hidden // tn_eff)

    # ---- dtype / layout prep -------------------------------------------------
    # Pre-transpose weights once (outside the hot loop) so the kernel runs
    # standard (M,K)x(K,N) matmuls and W2's DMA reads contiguous d_model rows.
    x2 = x.reshape(n, d_model).astype(param_dtype)
    if n_pad != n:
        x2 = jnp.pad(x2, ((0, n_pad - n), (0, 0)))
    w1t = w1.astype(param_dtype).T            # (d_model, hidden)
    w3t = w3.astype(param_dtype).T            # (d_model, hidden)
    w2t = w2.astype(param_dtype).T            # (hidden, d_model)
    b1r = b1.reshape(1, hidden).astype(jnp.float32)
    b3r = b3.reshape(1, hidden).astype(jnp.float32)
    b2r = b2.reshape(1, d_model).astype(jnp.float32)

    # ---- VMEM limit + cost hint ----------------------------------------------
    vmem_est = _vmem_bytes(tm_eff, tn_eff, d_model, pbytes, obytes, use_scratch)
    vmem_limit = int(min(max(int(1.15 * vmem_est), 32 * 2**20), vmem_budget))

    # Weights are re-read once per token tile unless fully resident (tn == hidden).
    weight_reads = 1 if tn_eff == hidden else max(1, n_pad // tm_eff)
    cost = pl.CostEstimate(
        flops=6 * n_pad * d_model * hidden,
        transcendentals=n_pad * hidden,
        bytes_accessed=(n_pad * d_model * (pbytes + obytes)
                        + 3 * d_model * hidden * pbytes * weight_reads
                        + (2 * hidden + d_model) * 4),
    )

    kernel = _ffn_kernel_f32_out if out_is_f32 else _ffn_kernel_acc
    scratch_shapes = ([] if out_is_f32
                      else [pltpu.VMEM((tm_eff, d_model), jnp.float32)])

    out = pl.pallas_call(
        kernel,
        out_shape=jax.ShapeDtypeStruct((n_pad, d_model), x.dtype),
        grid_spec=pltpu.PrefetchScalarGridSpec(
            num_scalar_prefetch=0,
            grid=grid,
            in_specs=[
                pl.BlockSpec((tm_eff, d_model), lambda i, j: (i, 0)),   # x
                pl.BlockSpec((d_model, tn_eff), lambda i, j: (0, j)),   # W1^T
                pl.BlockSpec((1, tn_eff), lambda i, j: (0, j)),         # b1
                pl.BlockSpec((d_model, tn_eff), lambda i, j: (0, j)),   # W3^T
                pl.BlockSpec((1, tn_eff), lambda i, j: (0, j)),         # b3
                pl.BlockSpec((tn_eff, d_model), lambda i, j: (j, 0)),   # W2^T
                pl.BlockSpec((1, d_model), lambda i, j: (0, 0)),        # b2
            ],
            out_specs=pl.BlockSpec((tm_eff, d_model), lambda i, j: (i, 0)),
            scratch_shapes=scratch_shapes,
        ),
        compiler_params=pltpu.CompilerParams(
            dimension_semantics=("parallel", "arbitrary"),
            vmem_limit_bytes=vmem_limit,
        ),
        cost_estimate=cost,
    )(x2, w1t, b1r, w3t, b3r, w2t, b2r)

    if n_pad != n:
        out = out[:n]
    return out.reshape(batch, seq, d_model)


# --------------------------------------------------------------------------- #
# reference + tests
# --------------------------------------------------------------------------- #
def _reference(x, w1, b1, w2, b2, w3, b3, param_dtype=jnp.bfloat16):
    """Pure-JAX reference with the same bf16-weight / f32-accumulate recipe."""
    xb = x.astype(param_dtype)
    h1 = jnp.einsum("bsd,hd->bsh", xb, w1.astype(param_dtype),
                    preferred_element_type=jnp.float32) + b1
    h3 = jnp.einsum("bsd,hd->bsh", xb, w3.astype(param_dtype),
                    preferred_element_type=jnp.float32) + b3
    h = ((h1 * jax.nn.sigmoid(h1)) * h3).astype(param_dtype)
    y = jnp.einsum("bsh,dh->bsd", h, w2.astype(param_dtype),
                   preferred_element_type=jnp.float32) + b2
    return y.astype(x.dtype)


def _make_params(key, d_model, hidden):
    k1, kb1, k2, kb2, k3, kb3 = jax.random.split(key, 6)
    w1 = jax.random.normal(k1, (hidden, d_model), dtype=jnp.float32) * 0.05
    b1 = jax.random.normal(kb1, (hidden,), dtype=jnp.float32) * 0.05
    w2 = jax.random.normal(k2, (d_model, hidden), dtype=jnp.float32) * 0.05
    b2 = jax.random.normal(kb2, (d_model,), dtype=jnp.float32) * 0.05
    w3 = jax.random.normal(k3, (hidden, d_model), dtype=jnp.float32) * 0.05
    b3 = jax.random.normal(kb3, (hidden,), dtype=jnp.float32) * 0.05
    return w1, b1, w2, b2, w3, b3


if __name__ == "__main__":
    key = jax.random.PRNGKey(0)

    # --- test 1: tiny shapes consistent with the module (d_model=32) --------
    batch, seq, d_model = 2, 8, 32
    hidden = 4 * d_model
    kx, kp = jax.random.split(key)
    x = jax.random.normal(kx, (batch, seq, d_model), dtype=jnp.float32)
    params = _make_params(kp, d_model, hidden)

    y = feed_forward(x, *params)               # auto tiles (weight-resident)
    y = jax.block_until_ready(y)
    y_ref = _reference(x, *params)
    assert y.shape == (batch, seq, d_model)
    assert jnp.allclose(y, y_ref, atol=2e-2, rtol=2e-2), "mismatch (small)"

    # --- test 2: forces a multi-tile grid (token axis + hidden accumulation) -
    batch2, seq2, d_model2 = 4, 128, 256
    hidden2 = 4 * d_model2
    kx2, kp2 = jax.random.split(jax.random.PRNGKey(1))
    x2 = jax.random.normal(kx2, (batch2, seq2, d_model2), dtype=jnp.float32)
    params2 = _make_params(kp2, d_model2, hidden2)

    y2 = feed_forward(x2, *params2, tm=128, tn=256)   # grid = (4, 4)
    y2 = jax.block_until_ready(y2)
    y2_ref = _reference(x2, *params2)
    assert y2.shape == (batch2, seq2, d_model2)
    assert jnp.allclose(y2, y2_ref, atol=2e-2, rtol=2e-2), "mismatch (tiled)"

    # --- test 3: auto-tuned tiles on the same shapes (streams or resides
    # depending on the chip's VMEM), plus ragged token count ------------------
    x3 = x2[:, :100]                                   # n = 400 (ragged)
    y3 = jax.block_until_ready(feed_forward(x3, *params2))
    y3_ref = _reference(x3, *params2)
    assert jnp.allclose(y3, y3_ref, atol=2e-2, rtol=2e-2), "mismatch (auto/ragged)"

    print("KERNEL_OK")
</pallas_src>

<mosaic_0001>
module attributes {stable_mosaic.version = 11 : i64} {
  func.func @_ffn_kernel_f32_out(%arg0: i32, %arg1: i32, %arg2: memref<16x32xbf16, #tpu.memory_space<vmem>>, %arg3: memref<32x128xbf16, #tpu.memory_space<vmem>>, %arg4: memref<1x128xf32, #tpu.memory_space<vmem>>, %arg5: memref<32x128xbf16, #tpu.memory_space<vmem>>, %arg6: memref<1x128xf32, #tpu.memory_space<vmem>>, %arg7: memref<128x32xbf16, #tpu.memory_space<vmem>>, %arg8: memref<1x32xf32, #tpu.memory_space<vmem>>, %arg9: memref<16x32xf32, #tpu.memory_space<vmem>>) attributes {dimension_semantics = [#tpu.dimension_semantics<parallel>, #tpu.dimension_semantics<arbitrary>], iteration_bounds = array<i64: 1, 1>, scalar_prefetch = 0 : i64, scratch_operands = 0 : i64, tpu.core_type = #tpu.core_type<tc>, window_params = [{transform_indices = @transform_0, window_bounds = array<i64: 16, 32>}, {transform_indices = @transform_1, window_bounds = array<i64: 32, 128>}, {transform_indices = @transform_2, window_bounds = array<i64: 1, 128>}, {transform_indices = @transform_3, window_bounds = array<i64: 32, 128>}, {transform_indices = @transform_4, window_bounds = array<i64: 1, 128>}, {transform_indices = @transform_5, window_bounds = array<i64: 128, 32>}, {pipeline_mode = #tpu.pipeline_mode<synchronous>, transform_indices = @transform_6, window_bounds = array<i64: 1, 32>}, {transform_indices = @transform_7, window_bounds = array<i64: 16, 32>}]} {
    %c0_i32 = arith.constant 0 : i32
    %0 = arith.cmpi eq, %arg1, %c0_i32 : i32
    %1 = arith.extui %0 : i1 to i32
    %c0_i32_0 = arith.constant 0 : i32
    %2 = arith.cmpi ne, %1, %c0_i32_0 : i32
    scf.if %2 {
      %cst_21 = arith.constant 0.000000e+00 : f32
      %30 = vector.broadcast %cst_21 : f32 to vector<16x32xf32>
      %c0_22 = arith.constant 0 : index
      %c0_23 = arith.constant 0 : index
      %31 = vector.load %arg9[%c0_22, %c0_23] : memref<16x32xf32, #tpu.memory_space<vmem>>, vector<16x32xf32>
      tpu.vector_store %arg9[%c0_22, %c0_23], %30 {strides = array<i32>} : memref<16x32xf32, #tpu.memory_space<vmem>>, vector<16x32xf32>,
    } else {
    }
    %c0 = arith.constant 0 : index
    %c0_1 = arith.constant 0 : index
    %3 = vector.load %arg9[%c0, %c0_1] : memref<16x32xf32, #tpu.memory_space<vmem>>, vector<16x32xf32>
    %c0_2 = arith.constant 0 : index
    %c0_3 = arith.constant 0 : index
    %4 = vector.load %arg2[%c0_2, %c0_3] : memref<16x32xbf16, #tpu.memory_space<vmem>>, vector<16x32xbf16>
    %c0_4 = arith.constant 0 : index
    %c0_5 = arith.constant 0 : index
    %5 = vector.load %arg3[%c0_4, %c0_5] : memref<32x128xbf16, #tpu.memory_space<vmem>>, vector<32x128xbf16>
    %cst = arith.constant dense<0.000000e+00> : vector<16x128xf32>
    %6 = tpu.matmul %4, %5, %cst {dimension_numbers = #tpu.dot_dimension_numbers<[1], [0], [0], [1], [0, 0, 1, 1], [], []>} : vector<16x32xbf16>, vector<32x128xbf16>, vector<16x128xf32> -> vector<16x128xf32>
    %c0_6 = arith.constant 0 : index
    %c0_7 = arith.constant 0 : index
    %7 = vector.load %arg4[%c0_6, %c0_7] : memref<1x128xf32, #tpu.memory_space<vmem>>, vector<1x128xf32>
    %8 = vector.broadcast %7 : vector<1x128xf32> to vector<16x128xf32>
    %9 = arith.addf %6, %8 : vector<16x128xf32>
    %c0_8 = arith.constant 0 : index
    %c0_9 = arith.constant 0 : index
    %10 = vector.load %arg5[%c0_8, %c0_9] : memref<32x128xbf16, #tpu.memory_space<vmem>>, vector<32x128xbf16>
    %cst_10 = arith.constant dense<0.000000e+00> : vector<16x128xf32>
    %11 = tpu.matmul %4, %10, %cst_10 {dimension_numbers = #tpu.dot_dimension_numbers<[1], [0], [0], [1], [0, 0, 1, 1], [], []>} : vector<16x32xbf16>, vector<32x128xbf16>, vector<16x128xf32> -> vector<16x128xf32>
    %c0_11 = arith.constant 0 : index
    %c0_12 = arith.constant 0 : index
    %12 = vector.load %arg6[%c0_11, %c0_12] : memref<1x128xf32, #tpu.memory_space<vmem>>, vector<1x128xf32>
    %13 = vector.broadcast %12 : vector<1x128xf32> to vector<16x128xf32>
    %14 = arith.addf %11, %13 : vector<16x128xf32>
    %15 = arith.negf %9 : vector<16x128xf32>
    %16 = math.exp %15 : vector<16x128xf32>
    %cst_13 = arith.constant 1.000000e+00 : f32
    %17 = vector.broadcast %cst_13 : f32 to vector<16x128xf32>
    %18 = arith.addf %17, %16 : vector<16x128xf32>
    %19 = arith.divf %17, %18 : vector<16x128xf32>
    %20 = arith.mulf %9, %19 : vector<16x128xf32>
    %21 = arith.mulf %20, %14 : vector<16x128xf32>
    %22 = arith.truncf %21 : vector<16x128xf32> to vector<16x128xbf16>
    %c0_14 = arith.constant 0 : index
    %c0_15 = arith.constant 0 : index
    %23 = vector.load %arg7[%c0_14, %c0_15] : memref<128x32xbf16, #tpu.memory_space<vmem>>, vector<128x32xbf16>
    %cst_16 = arith.constant dense<0.000000e+00> : vector<16x32xf32>
    %24 = tpu.matmul %22, %23, %cst_16 {dimension_numbers = #tpu.dot_dimension_numbers<[1], [0], [0], [1], [0, 0, 1, 1], [], []>} : vector<16x128xbf16>, vector<128x32xbf16>, vector<16x32xf32> -> vector<16x32xf32>
    %25 = arith.addf %3, %24 : vector<16x32xf32>
    %c0_17 = arith.constant 0 : index
    %c0_18 = arith.constant 0 : index
    %26 = vector.load %arg9[%c0_17, %c0_18] : memref<16x32xf32, #tpu.memory_space<vmem>>, vector<16x32xf32>
    tpu.vector_store %arg9[%c0_17, %c0_18], %25 {strides = array<i32>} : memref<16x32xf32, #tpu.memory_space<vmem>>, vector<16x32xf32>,
    %c0_i32_19 = arith.constant 0 : i32
    %27 = arith.cmpi eq, %arg1, %c0_i32_19 : i32
    %28 = arith.extui %27 : i1 to i32
    %c0_i32_20 = arith.constant 0 : i32
    %29 = arith.cmpi ne, %28, %c0_i32_20 : i32
    scf.if %29 {
      %c0_21 = arith.constant 0 : index
      %c0_22 = arith.constant 0 : index
      %30 = vector.load %arg9[%c0_21, %c0_22] : memref<16x32xf32, #tpu.memory_space<vmem>>, vector<16x32xf32>
      %c0_23 = arith.constant 0 : index
      %c0_24 = arith.constant 0 : index
      %31 = vector.load %arg8[%c0_23, %c0_24] : memref<1x32xf32, #tpu.memory_space<vmem>>, vector<1x32xf32>
      %32 = vector.broadcast %31 : vector<1x32xf32> to vector<16x32xf32>
      %33 = arith.addf %30, %32 : vector<16x32xf32>
      %c0_25 = arith.constant 0 : index
      %c0_26 = arith.constant 0 : index
      %34 = vector.load %arg9[%c0_25, %c0_26] : memref<16x32xf32, #tpu.memory_space<vmem>>, vector<16x32xf32>
      tpu.vector_store %arg9[%c0_25, %c0_26], %33 {strides = array<i32>} : memref<16x32xf32, #tpu.memory_space<vmem>>, vector<16x32xf32>,
    } else {
    }
    return
  }
  func.func @transform_0(%arg0: i32, %arg1: i32) -> (i32, i32) {
    %c0_i32 = arith.constant 0 : i32
    %c0_i32_0 = arith.constant 0 : i32
    return %arg0, %c0_i32 : i32, i32
  }
  func.func @transform_1(%arg0: i32, %arg1: i32) -> (i32, i32) {
    %c0_i32 = arith.constant 0 : i32
    %c0_i32_0 = arith.constant 0 : i32
    return %c0_i32, %arg1 : i32, i32
  }
  func.func @transform_2(%arg0: i32, %arg1: i32) -> (i32, i32) {
    %c0_i32 = arith.constant 0 : i32
    %c0_i32_0 = arith.constant 0 : i32
    return %c0_i32, %arg1 : i32, i32
  }
  func.func @transform_3(%arg0: i32, %arg1: i32) -> (i32, i32) {
    %c0_i32 = arith.constant 0 : i32
    %c0_i32_0 = arith.constant 0 : i32
    return %c0_i32, %arg1 : i32, i32
  }
  func.func @transform_4(%arg0: i32, %arg1: i32) -> (i32, i32) {
    %c0_i32 = arith.constant 0 : i32
    %c0_i32_0 = arith.constant 0 : i32
    return %c0_i32, %arg1 : i32, i32
  }
  func.func @transform_5(%arg0: i32, %arg1: i32) -> (i32, i32) {
    %c0_i32 = arith.constant 0 : i32
    %c0_i32_0 = arith.constant 0 : i32
    return %arg1, %c0_i32 : i32, i32
  }
  func.func @transform_6(%arg0: i32, %arg1: i32) -> (i32, i32) {
    %c0_i32 = arith.constant 0 : i32
    %c0_i32_0 = arith.constant 0 : i32
    %c0_i32_1 = arith.constant 0 : i32
    return %c0_i32, %c0_i32_0 : i32, i32
  }
  func.func @transform_7(%arg0: i32, %arg1: i32) -> (i32, i32) {
    %c0_i32 = arith.constant 0 : i32
    %c0_i32_0 = arith.constant 0 : i32
    return %arg0, %c0_i32 : i32, i32
  }
}

</mosaic_0001>

<bundles_post_ra>
// kernel: feed_forward.1
= control target key start
LH: loop header
LB: loop body
LE: loop exit
PB: predicated region body
PF: predicated region fallthrough
CT: control target
= control target key end

     0   :  { %v453_v1 = vmov 0.0   ;;  %vm454_vm0 = vmmov 0   ;;  %vm32_vm1 = vcmask 261120   ;;  %s557_s0 = inlined_call_operand.vmem [shape: bf16[16,32], index: 0, kind: input, shape index: {}]   ;;  %s558_s1 = inlined_call_operand.vmem [shape: bf16[32,128], index: 1, kind: input, shape index: {}]   ;;  %s559_s2 = inlined_call_operand.vmem [shape: f32[1,128], index: 2, kind: input, shape index: {}]   ;;  %s560_s3 = inlined_call_operand.vmem [shape: bf16[32,128], index: 3, kind: input, shape index: {}]   ;;  %s561_s4 = inlined_call_operand.vmem [shape: f32[1,128], index: 4, kind: input, shape index: {}]   ;;  %s562_s5 = inlined_call_operand.vmem [shape: bf16[128,32], index: 5, kind: input, shape index: {}]   ;;  %s563_s6 = inlined_call_operand.vmem [shape: f32[1,32], index: 6, kind: input, shape index: {}]   ;;  %s564_s7 = inlined_call_operand.hbm [shape: f32[16,32], index: 7, kind: output, shape index: {}]  }
   0x1   :  { %v410_v0 = vld [vmem:[%s558_s1 + $0x8] sm:$0xff]   ;;  %369 = vmatprep.subr.bf16.mxu1 %v453_v1  ;;  %385 = vmatprep.subr.bf16.mxu0 %v453_v1  ;;  %v411_v2 = vld [vmem:[%s558_s1] sm:$0xff]   ;;  %33 = vst.msk [vmem:[#allocation2] sm:$0xff] %vm32_vm1, %v453_v1  ;;  %34 = vst.msk [vmem:[#allocation2 + $0x8] sm:$0xff] %vm32_vm1, %v453_v1 }
   0x2   :  { %370 = vmatpush3.bf16.msra.mxu1 %v410_v0  ;;  %373 = vmatprep.mubr.msk.bf16.mxu1 %vm454_vm0, %v453_v1  ;;  %v412_v3 = vld [vmem:[%s557_s0] sm:$0xff]   ;;  %v413_v4 = vld [vmem:[%s560_s3 + $0x8] sm:$0xff]  }
   0x3   :  { %371 = vmatprep.subr.bf16.mxu1 %v453_v1  ;;  %401 = vmatprep.mubr.msk.bf16.mxu0 %vm454_vm0, %v453_v1  ;;  %v414_v5 = vld [vmem:[%s560_s3] sm:$0xff]  }
   0x6   :  { %372 = vmatpush3.bf16.msra.mxu1 %v411_v2 }
   0x7   :  { %377 = vmatprep.subr.bf16.mxu1 %v453_v1 }
   0x9   :  { %374 = vmatmul.mubr.msk.bf16.vlgmr.msra.gmra.mxu1 %vm32_vm1, %v412_v3 }
   0xa   :  { %378 = vmatpush3.bf16.msra.mxu1 %v413_v4  ;;  %381 = vmatprep.mubr.msk.bf16.mxu1 %vm454_vm0, %v453_v1 }
   0xb   :  { %12 = vsyncpa [#allocation3], 0  ;;  %379 = vmatprep.subr.bf16.mxu1 %v453_v1  ;;  %v415_v6 = vld [vmem:[%s562_s5 + $0x38] sm:$0xff]   ;;  %v416_v7 = vld [vmem:[%s562_s5 + $0x30] sm:$0xff]   ;;  %s455_s27 = smov [#allocation2]  }
   0xc   :  { %386 = vmatpush3.bf16.msra.mxu0 %v415_v6  ;;  %v417_v8 = vld [vmem:[%s562_s5 + $0x28] sm:$0xff]   ;;  %v418_v9 = vld [vmem:[%s562_s5 + $0x20] sm:$0xff]   ;;  %v419_v10 = vld [vmem:[%s562_s5 + $0x18] sm:$0xff]   ;;  %s323_s28 = sshll.u32 %s455_s27, 4  ;;  %s324_s28 = int_to_ptr.vmem [resolvable:$true] %s323_s28 }
   0xd   :  { %387 = vmatprep.subr.bf16.mxu0 %v453_v1  ;;  %v420_v11 = vld [vmem:[%s562_s5 + $0x10] sm:$0xff]   ;;  %v421_v12 = vld [vmem:[%s562_s5 + $0x8] sm:$0xff]   ;;  %v422_v13 = vld [vmem:[%s562_s5] sm:$0xff]   ;;  %s431_s29 = scalar_lea.vmem %s324_s28, 256  ;;  %p436_p1 = scmp.lt.s32.totalorder %s324_s28, %s324_s28 }
   0xe   :  { %380 = vmatpush3.bf16.msra.mxu1 %v414_v5  ;;  %v334_v14 = vld [vmem:[%s559_s2] ss:$0 sm:$0xff]  ;;  %v36_v45 = vld [vmem:[#allocation2 + $0x8] sm:$0xff]  ;;  %p432_p0 = scmp.ne.s32.totalorder %s324_s28, %s431_s29  ;;  %p437_p2 = scmp.lt.s32.totalorder %s431_s29, %s431_s29 }
   0xf   :  { %v339_v32 = vld [vmem:[%s561_s4] ss:$0 sm:$0xff] }
  0x10   :  { %388 = vmatpush3.bf16.msra.mxu0 %v416_v7  ;;  %v35_v41 = vld [vmem:[#allocation2] sm:$0xff]  ;;  %p438_p3 = por %p437_p2, %p436_p1 }
  0x11   :  { %382 = vmatmul.mubr.msk.bf16.vlgmr.msra.gmra.mxu1 %vm32_vm1, %v412_v3  ;;  %389 = vmatprep.subr.bf16.mxu0 %v453_v1  ;;  %v353_v49 = vld [vmem:[%s563_s6] ss:$0 sm:$0xff] }
  0x12   :  { %p439_p4 = pnand %p438_p3, %p432_p0 }
  0x14   :  { %390 = vmatpush3.bf16.msra.mxu0 %v417_v8 }
  0x15   :  { %391 = vmatprep.subr.bf16.mxu0 %v453_v1 }
  0x18   :  { %392 = vmatpush3.bf16.msra.mxu0 %v418_v9 }
  0x19   :  { %393 = vmatprep.subr.bf16.mxu0 %v453_v1 }
  0x1c   :  { %394 = vmatpush3.bf16.msra.mxu0 %v419_v10 }
  0x1d   :  { %395 = vmatprep.subr.bf16.mxu0 %v453_v1 }
  0x20   :  { %396 = vmatpush3.bf16.msra.mxu0 %v420_v11 }
  0x21   :  { %397 = vmatprep.subr.bf16.mxu0 %v453_v1 }
  0x24   :  { %398 = vmatpush3.bf16.msra.mxu0 %v421_v12 }
  0x25   :  { %399 = vmatprep.subr.bf16.mxu0 %v453_v1 }
  0x28   :  { %400 = vmatpush3.bf16.msra.mxu0 %v422_v13 }
  0xc9   :  { %v105_v15 = vpop.f32.mrf.mxu1 }
  0xca   :  { %v106_v16 = vadd.f32 %v334_v14, %v105_v15 }
  0xcb   :  { %v375_v17 = vpop.f32.mrf.mxu1 }
  0xcc   :  { %v343_v18 = vmul.f32 -1.442695, %v106_v16 }
  0xcd   :  { %v108_v19 = vpop.f32.mrf.mxu1 }
  0xce   :  { %423 = vpow2.f32 %v343_v18  ;;  %v109_v20 = vadd.f32 %v334_v14, %v108_v19 }
  0xcf   :  { %v376_v21 = vpop.f32.mrf.mxu1 }
  0xd0   :  { %v344_v22 = vmul.f32 -1.442695, %v109_v20 }
  0xd1   :  { %v169_v23 = vpop.f32.mrf.mxu1 }
  0xd2   :  { %425 = vpow2.f32 %v344_v22  ;;  %v170_v34 = vadd.f32 %v339_v32, %v169_v23 }
  0xd3   :  { %v383_v24 = vpop.f32.mrf.mxu1 }
  0xd5   :  { %v172_v25 = vpop.f32.mrf.mxu1 }
  0xd6   :  { %v173_v37 = vadd.f32 %v339_v32, %v172_v25 }
  0xd7   :  { %v384_v26 = vpop.f32.mrf.mxu1 }
  0xdb   :  { %v424_v27 = vpop.eup %423 }
  0xdc   :  { %v182_v28 = vadd.f32 1.0, %v424_v27 }
  0xde   :  { %427 = vrcp.f32 %v182_v28 }
  0xdf   :  { %v426_v29 = vpop.eup %425 }
  0xe0   :  { %v183_v30 = vadd.f32 1.0, %v426_v29 }
  0xe2   :  { %429 = vrcp.f32 %v183_v30 }
  0xeb   :  { %v428_v31 = vpop.eup %427 }
  0xec   :  { %v188_v33 = vmul.f32 %v428_v31, %v106_v16 }
  0xee   :  { %v190_v38 = vmul.f32 %v188_v33, %v170_v34 }
  0xef   :  { %v430_v35 = vpop.eup %429 }
  0xf0   :  { %v189_v36 = vmul.f32 %v430_v35, %v109_v20 }
  0xf2   :  { %v191_v39 = vmul.f32 %v189_v36, %v173_v37 }
  0xf4   :  { %v192_v40 = vpack.c.bf16 %v191_v39, %v190_v38 }
  0xf6   :  { %402 = vmatmul.mubr.bf16.vlgmr.msra.gmra.mxu0 %v192_v40 }
 0x1b6   :  { %v291_v42 = vpop.f32.mrf.mxu0 }
 0x1b7   :  { %v298_v43 = vadd.f32 %v291_v42, %v35_v41 }
 0x1b8   :  { %v403_v44 = vpop.f32.mrf.mxu0 }
 0x1b9   :  { %300 = vst.msk [vmem:[#allocation2] sm:$0xff] %vm32_vm1, %v298_v43 }
 0x1ba   :  { %v294_v46 = vpop.f32.mrf.mxu0 }
 0x1bb   :  { %v299_v47 = vadd.f32 %v294_v46, %v36_v45 }
 0x1bc   :  { %v404_v48 = vpop.f32.mrf.mxu0 }
 0x1bd   :  { %301 = vst.msk [vmem:[#allocation2 + $0x8] sm:$0xff] %vm32_vm1, %v299_v47 }
 0x1c0   :  { %v305_v50 = vld [vmem:[#allocation2] sm:$0xff] }
 0x1c1   :  { %v314_v51 = vadd.f32 %v353_v49, %v305_v50 }
 0x1c3   :  { %316 = vst.msk [vmem:[#allocation2] sm:$0xff] %vm32_vm1, %v314_v51 }
 0x1c4   :  { %v306_v52 = vld [vmem:[#allocation2 + $0x8] sm:$0xff] }
 0x1c5   :  { %v315_v53 = vadd.f32 %v353_v49, %v306_v52 }
 0x1c7   :  { %317 = vst.msk [vmem:[#allocation2 + $0x8] sm:$0xff] %vm32_vm1, %v315_v53 }
 0x1c8   :  { %442 = shalt.err (!%p439_p4)
}
 0x1c9   :  { %s456_s30 = smov 128   ;;  %s457_s6 = smov 8  }
 0x1ca   :  { %329 = dma.vmem_to_hbm [thread:$0]  %s324_s28, 256, %s564_s7, [#allocation3], %s456_s30, %s456_s30, %s457_s6  }
 0x1cb   :  { %451 = dma.done.wait [#allocation3], 256  }
 0x1cc   :  { %452 = vsyncadd [#allocation3], 4294967040 }
 0x1cd   :  { %333 = vsyncpa [#allocation3], 1 }

</bundles_post_ra>
